<compile_context>
chip_gen: v6e
topology: v6e:2x2x1
jax: 0.10.0
libtpu: 0.0.40
codegen_flags: <defaults>
</compile_context>

<pallas_src>
import jax
import jax.numpy as jnp
import numpy as np
from jax import lax
from jax.experimental import pallas as pl
from jax.experimental.pallas import tpu as pltpu


# ----------------------------- Pallas kernel --------------------------------
def bilstm_fc_kernel(xx_ref,    # (T*B, 2D) f32 : row block s = [x[s] | x[T-1-s]]
                     wx_ref,    # (2D, 8H) f32  : input proj, interleaved gate cols
                     bx_ref,    # (1, 8H)  f32  : b_ih + b_hh (both dirs), interleaved
                     whh_ref,   # (2H, 8H) bf16 : block-diag recurrent weights
                     wfc_ref,   # (2H, C)  f32
                     bfc_ref,   # (1, C)   f32
                     out_ref):  # (B, C)   f32
    B, _ = out_ref.shape
    H2 = whh_ref.shape[0]                  # 2H
    T = xx_ref.shape[0] // B

    # --- hoisted input projection: one large MXU matmul for all t, both dirs ---
    gx = (jnp.dot(xx_ref[...], wx_ref[...], preferred_element_type=jnp.float32)
          + bx_ref[...])                                     # (T*B, 8H) f32

    whh = whh_ref[...]                                       # hoisted, loop-invariant

    h = jnp.zeros((B, H2), jnp.float32)                      # [h_fwd | h_bwd]
    c = jnp.zeros((B, H2), jnp.float32)                      # [c_fwd | c_bwd]

    # --- fused + fully-unrolled recurrence (T static, indices static) ---
    for s in range(T):
        gates = (jnp.dot(h.astype(whh.dtype), whh,
                         preferred_element_type=jnp.float32)
                 + gx[s * B:(s + 1) * B, :])                 # (B, 8H) f32
        sig = jax.nn.sigmoid(gates)                          # whole-vreg EUP pass
        th = jnp.tanh(gates)                                 # whole-vreg EUP pass
        i = sig[:, 0 * H2:1 * H2]                            # [i_f | i_b]
        f = sig[:, 1 * H2:2 * H2]                            # [f_f | f_b]
        g = th[:, 2 * H2:3 * H2]                             # [g_f | g_b]
        o = sig[:, 3 * H2:4 * H2]                            # [o_f | o_b]
        c = f * c + i * g
        h = o * jnp.tanh(c)

    # --- fc(cat(h_f, h_b)): h is already stored concatenated ---
    out_ref[...] = (jnp.dot(h, wfc_ref[...], preferred_element_type=jnp.float32)
                    + bfc_ref[...])


# ------------------------------- wrapper -------------------------------------
def rnn_forward(x, params):
    """x: (batch, seq, word_dim) float32. Returns (batch, class_num)."""
    B, T, D = x.shape
    H = params["whh_f"].shape[1]
    C = params["wfc"].shape[0]

    def gates4(w):  # split the 4H (last) axis into PyTorch (i, f, g, o) blocks
        return [w[..., k * H:(k + 1) * H] for k in range(4)]

    xf = gates4(params["wih_f"].T)                       # each (D, H)
    xb = gates4(params["wih_b"].T)
    hf = gates4(params["whh_f"].T)                       # each (H, H)
    hb = gates4(params["whh_b"].T)
    bfw = gates4(params["bih_f"] + params["bhh_f"])      # each (H,)
    bbw = gates4(params["bih_b"] + params["bhh_b"])

    zD = jnp.zeros((D, H), jnp.float32)
    zH = jnp.zeros((H, H), jnp.float32)

    # interleaved gate layout along 8H: [i_f,i_b,f_f,f_b,g_f,g_b,o_f,o_b]
    wx = jnp.concatenate([
        jnp.concatenate([xf[0], zD, xf[1], zD, xf[2], zD, xf[3], zD], axis=1),
        jnp.concatenate([zD, xb[0], zD, xb[1], zD, xb[2], zD, xb[3]], axis=1),
    ], axis=0)                                                          # (2D, 8H)
    bx = jnp.concatenate([bfw[0], bbw[0], bfw[1], bbw[1],
                          bfw[2], bbw[2], bfw[3], bbw[3]])[None, :]     # (1, 8H)
    whh = jnp.concatenate([
        jnp.concatenate([hf[0], zH, hf[1], zH, hf[2], zH, hf[3], zH], axis=1),
        jnp.concatenate([zH, hb[0], zH, hb[1], zH, hb[2], zH, hb[3]], axis=1),
    ], axis=0).astype(jnp.bfloat16)                                     # (2H, 8H)

    wfc = params["wfc"].T                                 # (2H, C), rows [h_f ; h_b]
    bfc = params["bfc"][None, :]                          # (1, C)

    # x.permute(1,0,2), then pair each timestep with its time-reversed partner so
    # one matmul yields both directions' x-gates for every fused step.
    x_tbd = jnp.transpose(x, (1, 0, 2))                                 # (T, B, D)
    xx = jnp.concatenate([x_tbd.reshape(T * B, D),
                          x_tbd[::-1].reshape(T * B, D)], axis=1)       # (T*B, 2D)

    # NOTE: at larger T/B/D, add a grid over T (h/c as persistent VMEM scratch,
    # axis "arbitrary") + vmem_limit_bytes instead of keeping all of x resident.
    vmem = pl.BlockSpec(memory_space=pltpu.MemorySpace.VMEM)
    return pl.pallas_call(
        bilstm_fc_kernel,
        out_shape=jax.ShapeDtypeStruct((B, C), jnp.float32),
        in_specs=[vmem] * 6,
        out_specs=vmem,
    )(xx, wx, bx, whh, wfc, bfc)


# ---------------------------- pure-JAX reference ------------------------------
def rnn_reference(x, params):
    B, T, D = x.shape
    H = params["whh_f"].shape[1]
    x_tbd = jnp.transpose(x, (1, 0, 2))

    def run_dir(xs, wih, whh, bih, bhh):
        def step(carry, x_t):
            h, c = carry
            gates = x_t @ wih.T + h @ whh.T + bih + bhh
            i = jax.nn.sigmoid(gates[:, 0:H])
            f = jax.nn.sigmoid(gates[:, H:2 * H])
            g = jnp.tanh(gates[:, 2 * H:3 * H])
            o = jax.nn.sigmoid(gates[:, 3 * H:4 * H])
            c = f * c + i * g
            h = o * jnp.tanh(c)
            return (h, c), h
        h0 = jnp.zeros((B, H), jnp.float32)
        (h, c), _ = lax.scan(step, (h0, h0), xs)
        return h

    h_fwd = run_dir(x_tbd, params["wih_f"], params["whh_f"],
                    params["bih_f"], params["bhh_f"])
    h_bwd = run_dir(x_tbd[::-1], params["wih_b"], params["whh_b"],
                    params["bih_b"], params["bhh_b"])
    h_cat = jnp.concatenate([h_fwd, h_bwd], axis=1)
    return h_cat @ params["wfc"].T + params["bfc"]


# --------------------------------- main ---------------------------------------
if __name__ == "__main__":
    # args: word_dim=16, hidden_size=32, num_layers=1, bidirectional=True,
    #       dropout=0.0 (no-op for single layer), class_num=4
    B, T, D, H, C = 2, 8, 16, 32, 4

    key = jax.random.PRNGKey(0)
    ks = jax.random.split(key, 11)
    k = 1.0 / np.sqrt(H)   # PyTorch default uniform(-1/sqrt(H), 1/sqrt(H))

    def u(kk, shape):
        return jax.random.uniform(kk, shape, jnp.float32, minval=-k, maxval=k)

    params = {
        # forward direction, PyTorch layout: W_ih (4H, D), W_hh (4H, H), biases (4H,)
        "wih_f": u(ks[0], (4 * H, D)),
        "whh_f": u(ks[1], (4 * H, H)),
        "bih_f": u(ks[2], (4 * H,)),
        "bhh_f": u(ks[3], (4 * H,)),
        # backward direction
        "wih_b": u(ks[4], (4 * H, D)),
        "whh_b": u(ks[5], (4 * H, H)),
        "bih_b": u(ks[6], (4 * H,)),
        "bhh_b": u(ks[7], (4 * H,)),
        # fc: Linear(2H -> C)
        "wfc": u(ks[8], (C, 2 * H)),
        "bfc": u(ks[9], (C,)),
    }

    x = jax.random.normal(ks[10], (B, T, D), jnp.float32)

    out = jax.block_until_ready(rnn_forward(x, params))
    ref = jax.block_until_ready(rnn_reference(x, params))

    # tolerance loosened vs the pure-f32 reference because the recurrent matmul
    # uses bf16 operands (f32 accumulation), per the perf review.
    np.testing.assert_allclose(np.asarray(out), np.asarray(ref),
                               rtol=1e-2, atol=1e-2)
    print("KERNEL_OK")
</pallas_src>

<mosaic_0001>
module attributes {stable_mosaic.version = 11 : i64} {
  func.func @bilstm_fc_kernel(%arg0: memref<16x32xf32, #tpu.memory_space<vmem>>, %arg1: memref<32x256xf32, #tpu.memory_space<vmem>>, %arg2: memref<1x256xf32, #tpu.memory_space<vmem>>, %arg3: memref<64x256xbf16, #tpu.memory_space<vmem>>, %arg4: memref<64x4xf32, #tpu.memory_space<vmem>>, %arg5: memref<1x4xf32, #tpu.memory_space<vmem>>, %arg6: memref<2x4xf32, #tpu.memory_space<vmem>>) attributes {dimension_semantics = [], scalar_prefetch = 0 : i64, scratch_operands = 0 : i64, tpu.core_type = #tpu.core_type<tc>} {
    %c0 = arith.constant 0 : index
    %c0_0 = arith.constant 0 : index
    %0 = vector.load %arg0[%c0, %c0_0] : memref<16x32xf32, #tpu.memory_space<vmem>>, vector<16x32xf32>
    %c0_1 = arith.constant 0 : index
    %c0_2 = arith.constant 0 : index
    %1 = vector.load %arg1[%c0_1, %c0_2] : memref<32x256xf32, #tpu.memory_space<vmem>>, vector<32x256xf32>
    %cst = arith.constant dense<0.000000e+00> : vector<16x256xf32>
    %2 = tpu.matmul %0, %1, %cst {dimension_numbers = #tpu.dot_dimension_numbers<[1], [0], [0], [1], [0, 0, 1, 1], [], []>} : vector<16x32xf32>, vector<32x256xf32>, vector<16x256xf32> -> vector<16x256xf32>
    %c0_3 = arith.constant 0 : index
    %c0_4 = arith.constant 0 : index
    %3 = vector.load %arg2[%c0_3, %c0_4] : memref<1x256xf32, #tpu.memory_space<vmem>>, vector<1x256xf32>
    %4 = vector.broadcast %3 : vector<1x256xf32> to vector<16x256xf32>
    %5 = arith.addf %2, %4 : vector<16x256xf32>
    %c0_5 = arith.constant 0 : index
    %c0_6 = arith.constant 0 : index
    %6 = vector.load %arg3[%c0_5, %c0_6] : memref<64x256xbf16, #tpu.memory_space<vmem>>, vector<64x256xbf16>
    %cst_7 = arith.constant 0.000000e+00 : f32
    %7 = vector.broadcast %cst_7 : f32 to vector<2x64xf32>
    %cst_8 = arith.constant 0.000000e+00 : f32
    %8 = vector.broadcast %cst_8 : f32 to vector<2x64xf32>
    %9 = arith.truncf %7 : vector<2x64xf32> to vector<2x64xbf16>
    %cst_9 = arith.constant dense<0.000000e+00> : vector<2x256xf32>
    %10 = tpu.matmul %9, %6, %cst_9 {dimension_numbers = #tpu.dot_dimension_numbers<[1], [0], [0], [1], [0, 0, 1, 1], [], []>} : vector<2x64xbf16>, vector<64x256xbf16>, vector<2x256xf32> -> vector<2x256xf32>
    %11 = vector.extract_strided_slice %5 {offsets = [0, 0], sizes = [2, 256], strides = [1, 1]} : vector<16x256xf32> to vector<2x256xf32>
    %12 = arith.addf %10, %11 : vector<2x256xf32>
    %13 = arith.negf %12 : vector<2x256xf32>
    %14 = math.exp %13 : vector<2x256xf32>
    %cst_10 = arith.constant 1.000000e+00 : f32
    %15 = vector.broadcast %cst_10 : f32 to vector<2x256xf32>
    %16 = arith.addf %15, %14 : vector<2x256xf32>
    %17 = arith.divf %15, %16 : vector<2x256xf32>
    %18 = math.tanh %12 : vector<2x256xf32>
    %19 = vector.extract_strided_slice %17 {offsets = [0, 0], sizes = [2, 64], strides = [1, 1]} : vector<2x256xf32> to vector<2x64xf32>
    %20 = vector.extract_strided_slice %17 {offsets = [0, 64], sizes = [2, 64], strides = [1, 1]} : vector<2x256xf32> to vector<2x64xf32>
    %21 = vector.extract_strided_slice %18 {offsets = [0, 128], sizes = [2, 64], strides = [1, 1]} : vector<2x256xf32> to vector<2x64xf32>
    %22 = vector.extract_strided_slice %17 {offsets = [0, 192], sizes = [2, 64], strides = [1, 1]} : vector<2x256xf32> to vector<2x64xf32>
    %23 = arith.mulf %20, %8 : vector<2x64xf32>
    %24 = arith.mulf %19, %21 : vector<2x64xf32>
    %25 = arith.addf %23, %24 : vector<2x64xf32>
    %26 = math.tanh %25 : vector<2x64xf32>
    %27 = arith.mulf %22, %26 : vector<2x64xf32>
    %28 = arith.truncf %27 : vector<2x64xf32> to vector<2x64xbf16>
    %cst_11 = arith.constant dense<0.000000e+00> : vector<2x256xf32>
    %29 = tpu.matmul %28, %6, %cst_11 {dimension_numbers = #tpu.dot_dimension_numbers<[1], [0], [0], [1], [0, 0, 1, 1], [], []>} : vector<2x64xbf16>, vector<64x256xbf16>, vector<2x256xf32> -> vector<2x256xf32>
    %30 = vector.extract_strided_slice %5 {offsets = [2, 0], sizes = [2, 256], strides = [1, 1]} : vector<16x256xf32> to vector<2x256xf32>
    %31 = arith.addf %29, %30 : vector<2x256xf32>
    %32 = arith.negf %31 : vector<2x256xf32>
    %33 = math.exp %32 : vector<2x256xf32>
    %cst_12 = arith.constant 1.000000e+00 : f32
    %34 = vector.broadcast %cst_12 : f32 to vector<2x256xf32>
    %35 = arith.addf %34, %33 : vector<2x256xf32>
    %36 = arith.divf %34, %35 : vector<2x256xf32>
    %37 = math.tanh %31 : vector<2x256xf32>
    %38 = vector.extract_strided_slice %36 {offsets = [0, 0], sizes = [2, 64], strides = [1, 1]} : vector<2x256xf32> to vector<2x64xf32>
    %39 = vector.extract_strided_slice %36 {offsets = [0, 64], sizes = [2, 64], strides = [1, 1]} : vector<2x256xf32> to vector<2x64xf32>
    %40 = vector.extract_strided_slice %37 {offsets = [0, 128], sizes = [2, 64], strides = [1, 1]} : vector<2x256xf32> to vector<2x64xf32>
    %41 = vector.extract_strided_slice %36 {offsets = [0, 192], sizes = [2, 64], strides = [1, 1]} : vector<2x256xf32> to vector<2x64xf32>
    %42 = arith.mulf %39, %25 : vector<2x64xf32>
    %43 = arith.mulf %38, %40 : vector<2x64xf32>
    %44 = arith.addf %42, %43 : vector<2x64xf32>
    %45 = math.tanh %44 : vector<2x64xf32>
    %46 = arith.mulf %41, %45 : vector<2x64xf32>
    %47 = arith.truncf %46 : vector<2x64xf32> to vector<2x64xbf16>
    %cst_13 = arith.constant dense<0.000000e+00> : vector<2x256xf32>
    %48 = tpu.matmul %47, %6, %cst_13 {dimension_numbers = #tpu.dot_dimension_numbers<[1], [0], [0], [1], [0, 0, 1, 1], [], []>} : vector<2x64xbf16>, vector<64x256xbf16>, vector<2x256xf32> -> vector<2x256xf32>
    %49 = vector.extract_strided_slice %5 {offsets = [4, 0], sizes = [2, 256], strides = [1, 1]} : vector<16x256xf32> to vector<2x256xf32>
    %50 = arith.addf %48, %49 : vector<2x256xf32>
    %51 = arith.negf %50 : vector<2x256xf32>
    %52 = math.exp %51 : vector<2x256xf32>
    %cst_14 = arith.constant 1.000000e+00 : f32
    %53 = vector.broadcast %cst_14 : f32 to vector<2x256xf32>
    %54 = arith.addf %53, %52 : vector<2x256xf32>
    %55 = arith.divf %53, %54 : vector<2x256xf32>
    %56 = math.tanh %50 : vector<2x256xf32>
    %57 = vector.extract_strided_slice %55 {offsets = [0, 0], sizes = [2, 64], strides = [1, 1]} : vector<2x256xf32> to vector<2x64xf32>
    %58 = vector.extract_strided_slice %55 {offsets = [0, 64], sizes = [2, 64], strides = [1, 1]} : vector<2x256xf32> to vector<2x64xf32>
    %59 = vector.extract_strided_slice %56 {offsets = [0, 128], sizes = [2, 64], strides = [1, 1]} : vector<2x256xf32> to vector<2x64xf32>
    %60 = vector.extract_strided_slice %55 {offsets = [0, 192], sizes = [2, 64], strides = [1, 1]} : vector<2x256xf32> to vector<2x64xf32>
    %61 = arith.mulf %58, %44 : vector<2x64xf32>
    %62 = arith.mulf %57, %59 : vector<2x64xf32>
    %63 = arith.addf %61, %62 : vector<2x64xf32>
    %64 = math.tanh %63 : vector<2x64xf32>
    %65 = arith.mulf %60, %64 : vector<2x64xf32>
    %66 = arith.truncf %65 : vector<2x64xf32> to vector<2x64xbf16>
    %cst_15 = arith.constant dense<0.000000e+00> : vector<2x256xf32>
    %67 = tpu.matmul %66, %6, %cst_15 {dimension_numbers = #tpu.dot_dimension_numbers<[1], [0], [0], [1], [0, 0, 1, 1], [], []>} : vector<2x64xbf16>, vector<64x256xbf16>, vector<2x256xf32> -> vector<2x256xf32>
    %68 = vector.extract_strided_slice %5 {offsets = [6, 0], sizes = [2, 256], strides = [1, 1]} : vector<16x256xf32> to vector<2x256xf32>
    %69 = arith.addf %67, %68 : vector<2x256xf32>
    %70 = arith.negf %69 : vector<2x256xf32>
    %71 = math.exp %70 : vector<2x256xf32>
    %cst_16 = arith.constant 1.000000e+00 : f32
    %72 = vector.broadcast %cst_16 : f32 to vector<2x256xf32>
    %73 = arith.addf %72, %71 : vector<2x256xf32>
    %74 = arith.divf %72, %73 : vector<2x256xf32>
    %75 = math.tanh %69 : vector<2x256xf32>
    %76 = vector.extract_strided_slice %74 {offsets = [0, 0], sizes = [2, 64], strides = [1, 1]} : vector<2x256xf32> to vector<2x64xf32>
    %77 = vector.extract_strided_slice %74 {offsets = [0, 64], sizes = [2, 64], strides = [1, 1]} : vector<2x256xf32> to vector<2x64xf32>
    %78 = vector.extract_strided_slice %75 {offsets = [0, 128], sizes = [2, 64], strides = [1, 1]} : vector<2x256xf32> to vector<2x64xf32>
    %79 = vector.extract_strided_slice %74 {offsets = [0, 192], sizes = [2, 64], strides = [1, 1]} : vector<2x256xf32> to vector<2x64xf32>
    %80 = arith.mulf %77, %63 : vector<2x64xf32>
    %81 = arith.mulf %76, %78 : vector<2x64xf32>
    %82 = arith.addf %80, %81 : vector<2x64xf32>
    %83 = math.tanh %82 : vector<2x64xf32>
    %84 = arith.mulf %79, %83 : vector<2x64xf32>
    %85 = arith.truncf %84 : vector<2x64xf32> to vector<2x64xbf16>
    %cst_17 = arith.constant dense<0.000000e+00> : vector<2x256xf32>
    %86 = tpu.matmul %85, %6, %cst_17 {dimension_numbers = #tpu.dot_dimension_numbers<[1], [0], [0], [1], [0, 0, 1, 1], [], []>} : vector<2x64xbf16>, vector<64x256xbf16>, vector<2x256xf32> -> vector<2x256xf32>
    %87 = vector.extract_strided_slice %5 {offsets = [8, 0], sizes = [2, 256], strides = [1, 1]} : vector<16x256xf32> to vector<2x256xf32>
    %88 = arith.addf %86, %87 : vector<2x256xf32>
    %89 = arith.negf %88 : vector<2x256xf32>
    %90 = math.exp %89 : vector<2x256xf32>
    %cst_18 = arith.constant 1.000000e+00 : f32
    %91 = vector.broadcast %cst_18 : f32 to vector<2x256xf32>
    %92 = arith.addf %91, %90 : vector<2x256xf32>
    %93 = arith.divf %91, %92 : vector<2x256xf32>
    %94 = math.tanh %88 : vector<2x256xf32>
    %95 = vector.extract_strided_slice %93 {offsets = [0, 0], sizes = [2, 64], strides = [1, 1]} : vector<2x256xf32> to vector<2x64xf32>
    %96 = vector.extract_strided_slice %93 {offsets = [0, 64], sizes = [2, 64], strides = [1, 1]} : vector<2x256xf32> to vector<2x64xf32>
    %97 = vector.extract_strided_slice %94 {offsets = [0, 128], sizes = [2, 64], strides = [1, 1]} : vector<2x256xf32> to vector<2x64xf32>
    %98 = vector.extract_strided_slice %93 {offsets = [0, 192], sizes = [2, 64], strides = [1, 1]} : vector<2x256xf32> to vector<2x64xf32>
    %99 = arith.mulf %96, %82 : vector<2x64xf32>
    %100 = arith.mulf %95, %97 : vector<2x64xf32>
    %101 = arith.addf %99, %100 : vector<2x64xf32>
    %102 = math.tanh %101 : vector<2x64xf32>
    %103 = arith.mulf %98, %102 : vector<2x64xf32>
    %104 = arith.truncf %103 : vector<2x64xf32> to vector<2x64xbf16>
    %cst_19 = arith.constant dense<0.000000e+00> : vector<2x256xf32>
    %105 = tpu.matmul %104, %6, %cst_19 {dimension_numbers = #tpu.dot_dimension_numbers<[1], [0], [0], [1], [0, 0, 1, 1], [], []>} : vector<2x64xbf16>, vector<64x256xbf16>, vector<2x256xf32> -> vector<2x256xf32>
    %106 = vector.extract_strided_slice %5 {offsets = [10, 0], sizes = [2, 256], strides = [1, 1]} : vector<16x256xf32> to vector<2x256xf32>
    %107 = arith.addf %105, %106 : vector<2x256xf32>
    %108 = arith.negf %107 : vector<2x256xf32>
    %109 = math.exp %108 : vector<2x256xf32>
    %cst_20 = arith.constant 1.000000e+00 : f32
    %110 = vector.broadcast %cst_20 : f32 to vector<2x256xf32>
    %111 = arith.addf %110, %109 : vector<2x256xf32>
    %112 = arith.divf %110, %111 : vector<2x256xf32>
    %113 = math.tanh %107 : vector<2x256xf32>
    %114 = vector.extract_strided_slice %112 {offsets = [0, 0], sizes = [2, 64], strides = [1, 1]} : vector<2x256xf32> to vector<2x64xf32>
    %115 = vector.extract_strided_slice %112 {offsets = [0, 64], sizes = [2, 64], strides = [1, 1]} : vector<2x256xf32> to vector<2x64xf32>
    %116 = vector.extract_strided_slice %113 {offsets = [0, 128], sizes = [2, 64], strides = [1, 1]} : vector<2x256xf32> to vector<2x64xf32>
    %117 = vector.extract_strided_slice %112 {offsets = [0, 192], sizes = [2, 64], strides = [1, 1]} : vector<2x256xf32> to vector<2x64xf32>
    %118 = arith.mulf %115, %101 : vector<2x64xf32>
    %119 = arith.mulf %114, %116 : vector<2x64xf32>
    %120 = arith.addf %118, %119 : vector<2x64xf32>
    %121 = math.tanh %120 : vector<2x64xf32>
    %122 = arith.mulf %117, %121 : vector<2x64xf32>
    %123 = arith.truncf %122 : vector<2x64xf32> to vector<2x64xbf16>
    %cst_21 = arith.constant dense<0.000000e+00> : vector<2x256xf32>
    %124 = tpu.matmul %123, %6, %cst_21 {dimension_numbers = #tpu.dot_dimension_numbers<[1], [0], [0], [1], [0, 0, 1, 1], [], []>} : vector<2x64xbf16>, vector<64x256xbf16>, vector<2x256xf32> -> vector<2x256xf32>
    %125 = vector.extract_strided_slice %5 {offsets = [12, 0], sizes = [2, 256], strides = [1, 1]} : vector<16x256xf32> to vector<2x256xf32>
    %126 = arith.addf %124, %125 : vector<2x256xf32>
    %127 = arith.negf %126 : vector<2x256xf32>
    %128 = math.exp %127 : vector<2x256xf32>
    %cst_22 = arith.constant 1.000000e+00 : f32
    %129 = vector.broadcast %cst_22 : f32 to vector<2x256xf32>
    %130 = arith.addf %129, %128 : vector<2x256xf32>
    %131 = arith.divf %129, %130 : vector<2x256xf32>
    %132 = math.tanh %126 : vector<2x256xf32>
    %133 = vector.extract_strided_slice %131 {offsets = [0, 0], sizes = [2, 64], strides = [1, 1]} : vector<2x256xf32> to vector<2x64xf32>
    %134 = vector.extract_strided_slice %131 {offsets = [0, 64], sizes = [2, 64], strides = [1, 1]} : vector<2x256xf32> to vector<2x64xf32>
    %135 = vector.extract_strided_slice %132 {offsets = [0, 128], sizes = [2, 64], strides = [1, 1]} : vector<2x256xf32> to vector<2x64xf32>
    %136 = vector.extract_strided_slice %131 {offsets = [0, 192], sizes = [2, 64], strides = [1, 1]} : vector<2x256xf32> to vector<2x64xf32>
    %137 = arith.mulf %134, %120 : vector<2x64xf32>
    %138 = arith.mulf %133, %135 : vector<2x64xf32>
    %139 = arith.addf %137, %138 : vector<2x64xf32>
    %140 = math.tanh %139 : vector<2x64xf32>
    %141 = arith.mulf %136, %140 : vector<2x64xf32>
    %142 = arith.truncf %141 : vector<2x64xf32> to vector<2x64xbf16>
    %cst_23 = arith.constant dense<0.000000e+00> : vector<2x256xf32>
    %143 = tpu.matmul %142, %6, %cst_23 {dimension_numbers = #tpu.dot_dimension_numbers<[1], [0], [0], [1], [0, 0, 1, 1], [], []>} : vector<2x64xbf16>, vector<64x256xbf16>, vector<2x256xf32> -> vector<2x256xf32>
    %144 = vector.extract_strided_slice %5 {offsets = [14, 0], sizes = [2, 256], strides = [1, 1]} : vector<16x256xf32> to vector<2x256xf32>
    %145 = arith.addf %143, %144 : vector<2x256xf32>
    %146 = arith.negf %145 : vector<2x256xf32>
    %147 = math.exp %146 : vector<2x256xf32>
    %cst_24 = arith.constant 1.000000e+00 : f32
    %148 = vector.broadcast %cst_24 : f32 to vector<2x256xf32>
    %149 = arith.addf %148, %147 : vector<2x256xf32>
    %150 = arith.divf %148, %149 : vector<2x256xf32>
    %151 = math.tanh %145 : vector<2x256xf32>
    %152 = vector.extract_strided_slice %150 {offsets = [0, 0], sizes = [2, 64], strides = [1, 1]} : vector<2x256xf32> to vector<2x64xf32>
    %153 = vector.extract_strided_slice %150 {offsets = [0, 64], sizes = [2, 64], strides = [1, 1]} : vector<2x256xf32> to vector<2x64xf32>
    %154 = vector.extract_strided_slice %151 {offsets = [0, 128], sizes = [2, 64], strides = [1, 1]} : vector<2x256xf32> to vector<2x64xf32>
    %155 = vector.extract_strided_slice %150 {offsets = [0, 192], sizes = [2, 64], strides = [1, 1]} : vector<2x256xf32> to vector<2x64xf32>
    %156 = arith.mulf %153, %139 : vector<2x64xf32>
    %157 = arith.mulf %152, %154 : vector<2x64xf32>
    %158 = arith.addf %156, %157 : vector<2x64xf32>
    %159 = math.tanh %158 : vector<2x64xf32>
    %160 = arith.mulf %155, %159 : vector<2x64xf32>
    %c0_25 = arith.constant 0 : index
    %c0_26 = arith.constant 0 : index
    %161 = vector.load %arg4[%c0_25, %c0_26] : memref<64x4xf32, #tpu.memory_space<vmem>>, vector<64x4xf32>
    %cst_27 = arith.constant dense<0.000000e+00> : vector<2x4xf32>
    %162 = tpu.matmul %160, %161, %cst_27 {dimension_numbers = #tpu.dot_dimension_numbers<[1], [0], [0], [1], [0, 0, 1, 1], [], []>} : vector<2x64xf32>, vector<64x4xf32>, vector<2x4xf32> -> vector<2x4xf32>
    %c0_28 = arith.constant 0 : index
    %c0_29 = arith.constant 0 : index
    %163 = vector.load %arg5[%c0_28, %c0_29] : memref<1x4xf32, #tpu.memory_space<vmem>>, vector<1x4xf32>
    %164 = vector.broadcast %163 : vector<1x4xf32> to vector<2x4xf32>
    %165 = arith.addf %162, %164 : vector<2x4xf32>
    %c0_30 = arith.constant 0 : index
    %c0_31 = arith.constant 0 : index
    %166 = vector.load %arg6[%c0_30, %c0_31] : memref<2x4xf32, #tpu.memory_space<vmem>>, vector<2x4xf32>
    tpu.vector_store %arg6[%c0_30, %c0_31], %165 {strides = array<i32>} : memref<2x4xf32, #tpu.memory_space<vmem>>, vector<2x4xf32>,
    return
  }
}

</mosaic_0001>

<bundles_post_ra>
// kernel: tpu_custom_call.1
= control target key start
LH: loop header
LB: loop body
LE: loop exit
PB: predicated region body
PF: predicated region fallthrough
CT: control target
= control target key end

     0   :  { %11 = vsyncpa [#allocation3], 0  ;;  %s1417_s0 = inlined_call_operand.hbm [shape: f32[16,32], index: 0, kind: input, shape index: {}]   ;;  %s1418_s1 = inlined_call_operand.vmem [shape: f32[32,256], index: 1, kind: input, shape index: {}]   ;;  %s1419_s2 = inlined_call_operand.vmem [shape: f32[1,256], index: 2, kind: input, shape index: {}]   ;;  %s1420_s3 = inlined_call_operand.hbm [shape: bf16[64,256], index: 3, kind: input, shape index: {}]   ;;  %s1421_s4 = inlined_call_operand.vmem [shape: f32[64,4], index: 4, kind: input, shape index: {}]   ;;  %s1422_s5 = inlined_call_operand.vmem [shape: f32[1,4], index: 5, kind: input, shape index: {}]   ;;  %s1423_s6 = inlined_call_operand.hbm [shape: f32[2,4], index: 6, kind: output, shape index: {}]  }
   0x1   :  { %12 = vsyncpa [#allocation6], 0 }
   0x2   :  { %13 = vsyncpa [#allocation4], 0  ;;  %s1146_s21 = smov [#allocation2]  }
   0x3   :  { %s19_s22 = sshll.u32 %s1146_s21, 4  ;;  %s20_s22 = int_to_ptr.vmem [resolvable:$true] %s19_s22 }
   0x4   :  { %s1088_s23 = scalar_lea.vmem %s20_s22, 256  ;;  %p1093_p1 = scmp.lt.s32.totalorder %s20_s22, %s20_s22 }
   0x5   :  { %p1089_p0 = scmp.ne.s32.totalorder %s20_s22, %s1088_s23  ;;  %p1094_p2 = scmp.lt.s32.totalorder %s1088_s23, %s1088_s23 }
   0x7   :  { %p1095_p3 = por %p1094_p2, %p1093_p1 }
   0x9   :  { %p1096_p4 = pnand %p1095_p3, %p1089_p0 }
   0xb   :  { %1099 = shalt.err (!%p1096_p4)
}
   0xc   :  { %s1147_s24 = smov 128   ;;  %s1148_s25 = smov 8  }
   0xd   :  { %25 = dma.hbm_to_vmem [thread:$0]  %s1417_s0, 256, %s20_s22, [#allocation3], %s1147_s24, %s1147_s24, %s1148_s25  }
   0xe   :  { %s1149_s28 = smov [#allocation5]  }
   0xf   :  { %s35_s29 = sshll.u32 %s1149_s28, 4  ;;  %s36_s29 = int_to_ptr.vmem [resolvable:$true] %s35_s29 }
  0x10   :  { %s1108_s30 = scalar_lea.vmem %s36_s29, 1024  ;;  %p1113_p6 = scmp.lt.s32.totalorder %s36_s29, %s36_s29 }
  0x11   :  { %p1109_p5 = scmp.ne.s32.totalorder %s36_s29, %s1108_s30  ;;  %p1114_p7 = scmp.lt.s32.totalorder %s1108_s30, %s1108_s30 }
  0x13   :  { %p1115_p8 = por %p1114_p7, %p1113_p6 }
  0x15   :  { %p1116_p9 = pnand %p1115_p8, %p1109_p5 }
  0x17   :  { %1119 = shalt.err (!%p1116_p9)
}
  0x18   :  { %41 = dma.hbm_to_vmem [thread:$0]  %s1420_s3, 1024, %s36_s29, [#allocation6], %s1147_s24, %s1147_s24, %s1148_s25  }
  0x19   :  { %1140 = dma.done.wait [#allocation3], 256  }
  0x1a   :  { %1141 = vsyncadd [#allocation3], 4294967040 }
  0x1b   :  { %1142 = dma.done.wait [#allocation6], 1024  }
  0x1c   :  { %1143 = vsyncadd [#allocation6], 4294966272  ;;  %v1150_v0 = vmov 0.0   ;;  %v1151_v1 = vmov 0   ;;  %v1198_v2 = vld [vmem:[#allocation5 + $0x34] ss:$8 sps:$4 sm:$0xff]   ;;  %v65_v19 = vlaneseq }
  0x1d   :  { %146 = vmatprep.mubr.f32.mxu0 %v1150_v0  ;;  %243 = vmatprep.mubr.bf16.mxu1 %v1151_v1  ;;  %v1200_v3 = vld [vmem:[#allocation5 + $0x30] ss:$8 sps:$4 sm:$0xff]   ;;  %v62_v4 = vld [vmem:[%s1418_s1 + $0x38] sm:$0xff]  ;;  %v61_v6 = vld [vmem:[%s1418_s1 + $0x30] sm:$0xff]  ;;  %vm75_vm0 = vcmask 261120   ;;  %vm207_vm1 = vcmask 523264  }
  0x1e   :  { %219 = vmatprep.subr.bf16.mxu1 %v1198_v2  ;;  %106 = vmatprep.subr.mxu0 %v62_v4  ;;  %v1206_v5 = vld [vmem:[#allocation5 + $0x24] ss:$8 sps:$4 sm:$0xff]   ;;  %v1212_v7 = vld [vmem:[#allocation5 + $0x20] ss:$8 sps:$4 sm:$0xff]   ;;  %v60_v8 = vld [vmem:[%s1418_s1 + $0x28] sm:$0xff]  ;;  %v66_v20 = vshrl.u32 %v65_v19, 7 }
  0x1f   :  { %220 = vmatpush1.bf16.msra.mxu1 %v1200_v3  ;;  %107 = vmatpush1.msra.mxu0 %v61_v6  ;;  %v59_v9 = vld [vmem:[%s1418_s1 + $0x20] sm:$0xff]  ;;  %v58_v10 = vld [vmem:[%s1418_s1 + $0x18] sm:$0xff]  ;;  %v57_v12 = vld [vmem:[%s1418_s1 + $0x10] sm:$0xff]  ;;  %vm1153_vm2 = vmmov 0   ;;  %s1154_s15 = smov [#allocation7]   ;;  %vm882_vm3 = vcmask 25600  }
  0x20   :  { %221 = vmatprep.subr.bf16.mxu1 %v1206_v5  ;;  %108 = vmatprep.subr.mxu0 %v60_v8  ;;  %v1224_v11 = vld [vmem:[#allocation5 + $0x14] ss:$8 sps:$4 sm:$0xff]   ;;  %v1229_v13 = vld [vmem:[#allocation5 + $0x10] ss:$8 sps:$4 sm:$0xff]   ;;  %v1239_v17 = vld [vmem:[#allocation5 + $0x4] ss:$8 sps:$4 sm:$0xff]  }
  0x21   :  { %109 = vmatpush1.msra.mxu0 %v59_v9  ;;  %v56_v14 = vld [vmem:[%s1418_s1 + $0x8] sm:$0xff]  ;;  %v55_v15 = vld [vmem:[%s1418_s1] sm:$0xff]  ;;  %v1244_v18 = vld [vmem:[#allocation5] ss:$8 sps:$4 sm:$0xff]   ;;  %v67_v21 = vsub.s32 0, %v66_v20  ;;  %v71_v31 = vsub.s32 1, %v66_v20 }
  0x22   :  { %110 = vmatprep.subr.mxu0 %v58_v10  ;;  %v53_v16 = vld [vmem:[#allocation2] sm:$0xff]  ;;  %v54_v42 = vld [vmem:[#allocation2 + $0x8] sm:$0xff]  ;;  %s890_s16 = sshll.u32 %s1154_s15, 4  ;;  %s891_s16 = int_to_ptr.vmem [resolvable:$true] %s890_s16 }
  0x23   :  { %222 = vmatpush1.bf16.msra.mxu1 %v1212_v7  ;;  %111 = vmatpush1.msra.mxu0 %v57_v12  ;;  %v63_v22 = vld [vmem:[%s1419_s2] sm:$0x3]  ;;  %s1152_s2 = smov 64   ;;  %s1120_s17 = scalar_lea.vmem %s891_s16, 32 }
  0x24   :  { %223 = vmatprep.subr.bf16.mxu1 %v1224_v11  ;;  %112 = vmatprep.subr.mxu0 %v56_v14  ;;  %v1271_v23 = vrot.slane %v63_v22, %v67_v21  ;;  %v1277_v33 = vrot.slane %v63_v22, %v71_v31  ;;  %p1121_p10 = scmp.ne.s32.totalorder %s891_s16, %s1120_s17  ;;  %p1125_p11 = scmp.lt.s32.totalorder %s891_s16, %s891_s16 }
  0x25   :  { %113 = vmatpush1.msra.mxu0 %v55_v15  ;;  %p1126_p12 = scmp.lt.s32.totalorder %s1120_s17, %s1120_s17 }
  0x26   :  { %900 = vmatmul.mubr.msk.f32.vlgmr.msra.gmra.mxu0 %vm75_vm0, %v53_v16  ;;  %295 = vmatprep.subr.bf16.mxu0 %v1198_v2 }
  0x27   :  { %224 = vmatpush1.bf16.msra.mxu1 %v1229_v13  ;;  %296 = vmatpush1.bf16.msra.mxu0 %v1200_v3  ;;  %p1127_p13 = por %p1126_p12, %p1125_p11 }
  0x28   :  { %225 = vmatprep.subr.bf16.mxu1 %v1239_v17  ;;  %297 = vmatprep.subr.bf16.mxu0 %v1206_v5 }
  0x29   :  { %152 = vmatprep.mubr.f32.mxu0 %v1150_v0  ;;  %p1128_p0 = pnand %p1127_p13, %p1121_p10 }
  0x2a   :  { %901 = vmatmul.mubr.msk.f32.gmra.mxu0 %vm75_vm0, %v54_v42 }
  0x2b   :  { %226 = vmatpush1.bf16.msra.mxu1 %v1244_v18  ;;  %298 = vmatpush1.bf16.msra.mxu0 %v1212_v7 }
  0x2c   :  { %299 = vmatprep.subr.bf16.mxu0 %v1224_v11  ;;  %369 = vmatprep.subr.bf16.mxu1 %v1198_v2 }
  0x2d   :  { %319 = vmatprep.mubr.bf16.mxu0 %v1151_v1 }
  0x2e   :  { %244 = vmatmul.mubr.bf16.vlgmr.msra.gmra.mxu1 %v1151_v1 }
  0x2f   :  { %300 = vmatpush1.bf16.msra.mxu0 %v1229_v13  ;;  %370 = vmatpush1.bf16.msra.mxu1 %v1200_v3 }
  0x30   :  { %301 = vmatprep.subr.bf16.mxu0 %v1239_v17  ;;  %371 = vmatprep.subr.bf16.mxu1 %v1206_v5 }
  0x31   :  { %393 = vmatprep.mubr.bf16.mxu1 %v1151_v1 }
  0x33   :  { %302 = vmatpush1.bf16.msra.mxu0 %v1244_v18  ;;  %372 = vmatpush1.bf16.msra.mxu1 %v1212_v7 }
  0x34   :  { %373 = vmatprep.subr.bf16.mxu1 %v1224_v11  ;;  %443 = vmatprep.subr.bf16.mxu0 %v1198_v2 }
  0x37   :  { %374 = vmatpush1.bf16.msra.mxu1 %v1229_v13 }
  0x38   :  { %375 = vmatprep.subr.bf16.mxu1 %v1239_v17 }
  0x3b   :  { %376 = vmatpush1.bf16.msra.mxu1 %v1244_v18 }
  0x3c   :  { %513 = vmatprep.subr.bf16.mxu1 %v1198_v2 }
  0xe6   :  { %v148_v24 = vpop.f32.mrf.mxu0 }
  0xe7   :  { %v1274_v25 = vadd.f32 %v148_v24, %v1271_v23 }
  0xe8   :  { %v150_v34 = vpop.f32.mrf.mxu0 }
  0xe9   :  { %v1280_v35 = vadd.f32 %v150_v34, %v1277_v33  ;;  %v280_v56 = vrot.slane %v1274_v25, 2 }
  0xea   :  { %v1297_v54 = vpop.f32.mrf.mxu0 }
  0xeb   :  { %v281_v63 = vrot.slane %v1280_v35, 2 }
  0xec   :  { %v1299_v55 = vpop.f32.mrf.mxu0 }
  0xee   :  { %v245_v26 = vpop.f32.mrf.mxu1 }
  0xef   :  { %v246_v27 = vadd.f32 %v245_v26, %v1274_v25 }
  0xf0   :  { %v247_v28 = vpop.f32.mrf.mxu1 }
  0xf1   :  { %v910_v29 = vmul.f32 -1.442695, %v246_v27  ;;  %v248_v36 = vadd.f32 %v247_v28, %v1280_v35 }
  0xf2   :  { %v249_v30 = vpop.f32.mrf.mxu1 }
  0xf3   :  { %984 = vpow2.f32 %v910_v29  ;;  %v911_v43 = vmul.f32 -1.442695, %v248_v36  ;;  %v354_v29 = vrot.slane %v1274_v25, 4 }
  0xf4   :  { %v250_v32 = vpop.f32.mrf.mxu1  ;;  %986 = vtanh.f32 %v248_v36 }
 0x100   :  { %v985_v37 = vpop.eup %984 }
 0x101   :  { %v258_v38 = vadd.f32 1.0, %v985_v37  ;;  %v987_v39 = vpop.eup %986 }
 0x103   :  { %988 = vrcp.f32 %v258_v38  ;;  %v355_v38 = vrot.slane %v1280_v35, 4 }
 0x104   :  { %990 = vpow2.f32 %v911_v43 }
 0x110   :  { %v989_v40 = vpop.eup %988 }
 0x111   :  { %v266_v41 = vmul.f32 %v989_v40, %v987_v39  ;;  %v991_v44 = vpop.eup %990  ;;  %v265_v46 = vmul.f32 0.0, %v989_v40 }
 0x112   :  { %v259_v45 = vadd.f32 1.0, %v991_v44 }
 0x113   :  { %268 = vrot.lane.b32.xlu0 %v266_v41, %s1152_s2 }
 0x114   :  { %992 = vrcp.f32 %v259_v45 }
 0x121   :  { %v993_v49 = vpop.eup %992 }
 0x185   :  { %v269_v47 = vpop.permute.xlu0 %268 }
 0x186   :  { %v271_v48 = vadd.f32 %v269_v47, %v265_v46 }
 0x188   :  { %994 = vtanh.f32 %v271_v48 }
 0x195   :  { %v995_v50 = vpop.eup %994 }
 0x196   :  { %v273_v51 = vmul.f32 %v995_v50, %v993_v49 }
 0x198   :  { %v274_v52 = vpack.c.bf16 %v273_v51, %v273_v51 }
 0x19a   :  { %276 = vrot.lane.b32.xlu0 %v274_v52, %s1152_s2 }
 0x20c   :  { %v277_v53 = vpop.permute.xlu0 %276 }
 0x20d   :  { %912 = vmatmul.mubr.msk.bf16.vlgmr.msra.gmra.mxu0 %vm207_vm1, %v277_v53 }
 0x20e   :  { %444 = vmatpush1.bf16.msra.mxu0 %v1200_v3  ;;  %467 = vmatprep.mubr.bf16.mxu0 %v1151_v1 }
 0x20f   :  { %445 = vmatprep.subr.bf16.mxu0 %v1206_v5 }
 0x212   :  { %446 = vmatpush1.bf16.msra.mxu0 %v1212_v7 }
 0x213   :  { %447 = vmatprep.subr.bf16.mxu0 %v1224_v11 }
 0x216   :  { %448 = vmatpush1.bf16.msra.mxu0 %v1229_v13 }
 0x217   :  { %449 = vmatprep.subr.bf16.mxu0 %v1239_v17 }
 0x21a   :  { %450 = vmatpush1.bf16.msra.mxu0 %v1244_v18 }
 0x21b   :  { %589 = vmatprep.subr.bf16.mxu0 %v1198_v2 }
 0x2cd   :  { %v321_v57 = vpop.f32.mrf.mxu0 }
 0x2ce   :  { %v322_v58 = vadd.f32 %v321_v57, %v280_v56 }
 0x2cf   :  { %v323_v59 = vpop.f32.mrf.mxu0 }
 0x2d0   :  { %v913_v60 = vmul.f32 -1.442695, %v322_v58  ;;  %v324_v4 = vadd.f32 %v323_v59, %v281_v63  ;;  %v428_v58 = vrot.slane %v1274_v25, 6 }
 0x2d1   :  { %v325_v61 = vpop.f32.mrf.mxu0 }
 0x2d2   :  { %996 = vpow2.f32 %v913_v60  ;;  %v914_v14 = vmul.f32 -1.442695, %v324_v4 }
 0x2d3   :  { %v326_v62 = vpop.f32.mrf.mxu0  ;;  %998 = vtanh.f32 %v324_v4 }
 0x2df   :  { %v997_v6 = vpop.eup %996 }
 0x2e0   :  { %v334_v8 = vadd.f32 1.0, %v997_v6  ;;  %v999_v9 = vpop.eup %998  ;;  %v429_v6 = vrot.slane %v1280_v35, 6 }
 0x2e2   :  { %1000 = vrcp.f32 %v334_v8 }
 0x2e3   :  { %1002 = vpow2.f32 %v914_v14 }
 0x2ef   :  { %v1001_v10 = vpop.eup %1000 }
 0x2f0   :  { %v342_v12 = vmul.f32 %v1001_v10, %v999_v9  ;;  %v1003_v15 = vpop.eup %1002  ;;  %v341_v19 = vmul.f32 %v1001_v10, %v271_v48 }
 0x2f1   :  { %v335_v16 = vadd.f32 1.0, %v1003_v15 }
 0x2f2   :  { %344 = vrot.lane.b32.xlu1 %v342_v12, %s1152_s2 }
 0x2f3   :  { %1004 = vrcp.f32 %v335_v16 }
 0x300   :  { %v1005_v22 = vpop.eup %1004 }
 0x364   :  { %v345_v20 = vpop.permute.xlu1 %344 }
 0x365   :  { %v347_v21 = vadd.f32 %v345_v20, %v341_v19 }
 0x367   :  { %1006 = vtanh.f32 %v347_v21 }
 0x374   :  { %v1007_v24 = vpop.eup %1006 }
 0x375   :  { %v349_v26 = vmul.f32 %v1007_v24, %v1005_v22 }
 0x377   :  { %v350_v27 = vpack.c.bf16 %v349_v26, %v349_v26 }
 0x379   :  { %352 = vrot.lane.b32.xlu1 %v350_v27, %s1152_s2 }
 0x3eb   :  { %v353_v28 = vpop.permute.xlu1 %352 }
 0x3ec   :  { %915 = vmatmul.mubr.msk.bf16.vlgmr.msra.gmra.mxu1 %vm207_vm1, %v353_v28  ;;  %v1345_v28 = vadd.f32 %v1297_v54, %v1271_v23 }
 0x3ed   :  { %514 = vmatpush1.bf16.msra.mxu1 %v1200_v3  ;;  %537 = vmatprep.mubr.bf16.mxu1 %v1151_v1 }
 0x3ee   :  { %515 = vmatprep.subr.bf16.mxu1 %v1206_v5 }
 0x3f1   :  { %516 = vmatpush1.bf16.msra.mxu1 %v1212_v7 }
 0x3f2   :  { %517 = vmatprep.subr.bf16.mxu1 %v1224_v11 }
 0x3f5   :  { %518 = vmatpush1.bf16.msra.mxu1 %v1229_v13 }
 0x3f6   :  { %519 = vmatprep.subr.bf16.mxu1 %v1239_v17 }
 0x3f9   :  { %520 = vmatpush1.bf16.msra.mxu1 %v1244_v18 }
 0x3fa   :  { %663 = vmatprep.subr.bf16.mxu1 %v1198_v2 }
 0x4ac   :  { %v395_v30 = vpop.f32.mrf.mxu1 }
 0x4ad   :  { %v396_v31 = vadd.f32 %v395_v30, %v354_v29 }
 0x4ae   :  { %v397_v32 = vpop.f32.mrf.mxu1 }
 0x4af   :  { %v916_v34 = vmul.f32 -1.442695, %v396_v31  ;;  %v398_v39 = vadd.f32 %v397_v32, %v355_v38 }
 0x4b0   :  { %v399_v36 = vpop.f32.mrf.mxu1 }
 0x4b1   :  { %1008 = vpow2.f32 %v916_v34  ;;  %v917_v45 = vmul.f32 -1.442695, %v398_v39 }
 0x4b2   :  { %v400_v37 = vpop.f32.mrf.mxu1  ;;  %1010 = vtanh.f32 %v398_v39 }
 0x4b3   :  { %v1350_v37 = vadd.f32 %v1299_v55, %v1277_v33 }
 0x4be   :  { %v1009_v40 = vpop.eup %1008 }
 0x4bf   :  { %v408_v41 = vadd.f32 1.0, %v1009_v40  ;;  %v1011_v42 = vpop.eup %1010 }
 0x4c1   :  { %1012 = vrcp.f32 %v408_v41 }
 0x4c2   :  { %1014 = vpow2.f32 %v917_v45 }
 0x4ce   :  { %v1013_v43 = vpop.eup %1012 }
 0x4cf   :  { %v416_v44 = vmul.f32 %v1013_v43, %v1011_v42  ;;  %v1015_v46 = vpop.eup %1014  ;;  %v415_v48 = vmul.f32 %v1013_v43, %v347_v21 }
 0x4d0   :  { %v409_v47 = vadd.f32 1.0, %v1015_v46 }
 0x4d1   :  { %418 = vrot.lane.b32.xlu0 %v416_v44, %s1152_s2 }
 0x4d2   :  { %1016 = vrcp.f32 %v409_v47 }
 0x4df   :  { %v1017_v51 = vpop.eup %1016 }
 0x543   :  { %v419_v49 = vpop.permute.xlu0 %418 }
 0x544   :  { %v421_v50 = vadd.f32 %v419_v49, %v415_v48 }
 0x546   :  { %1018 = vtanh.f32 %v421_v50 }
 0x553   :  { %v1019_v52 = vpop.eup %1018 }
 0x554   :  { %v423_v53 = vmul.f32 %v1019_v52, %v1017_v51  ;;  %v574_v51 = vrot.slane %v1345_v28, 2 }
 0x556   :  { %v424_v56 = vpack.c.bf16 %v423_v53, %v423_v53 }
 0x558   :  { %426 = vrot.lane.b32.xlu1 %v424_v56, %s1152_s2 }
 0x5ca   :  { %v427_v57 = vpop.permute.xlu1 %426 }
 0x5cb   :  { %918 = vmatmul.mubr.msk.bf16.vlgmr.msra.gmra.mxu0 %vm207_vm1, %v427_v57 }
 0x5cc   :  { %590 = vmatpush1.bf16.msra.mxu0 %v1200_v3  ;;  %613 = vmatprep.mubr.bf16.mxu0 %v1151_v1 }
 0x5cd   :  { %591 = vmatprep.subr.bf16.mxu0 %v1206_v5 }
 0x5d0   :  { %592 = vmatpush1.bf16.msra.mxu0 %v1212_v7 }
 0x5d1   :  { %593 = vmatprep.subr.bf16.mxu0 %v1224_v11 }
 0x5d4   :  { %594 = vmatpush1.bf16.msra.mxu0 %v1229_v13 }
 0x5d5   :  { %595 = vmatprep.subr.bf16.mxu0 %v1239_v17 }
 0x5d8   :  { %596 = vmatpush1.bf16.msra.mxu0 %v1244_v18 }
 0x5d9   :  { %737 = vmatprep.subr.bf16.mxu0 %v1198_v2 }
 0x68b   :  { %v469_v59 = vpop.f32.mrf.mxu0 }
 0x68c   :  { %v470_v60 = vadd.f32 %v469_v59, %v428_v58 }
 0x68d   :  { %v471_v61 = vpop.f32.mrf.mxu0 }
 0x68e   :  { %v919_v62 = vmul.f32 -1.442695, %v470_v60  ;;  %v472_v8 = vadd.f32 %v471_v61, %v429_v6 }
 0x68f   :  { %v473_v63 = vpop.f32.mrf.mxu0 }
 0x690   :  { %1020 = vpow2.f32 %v919_v62  ;;  %v920_v2 = vmul.f32 -1.442695, %v472_v8 }
 0x691   :  { %v474_v4 = vpop.f32.mrf.mxu0  ;;  %1022 = vtanh.f32 %v472_v8 }
 0x69d   :  { %v1021_v9 = vpop.eup %1020 }
 0x69e   :  { %v482_v10 = vadd.f32 1.0, %v1021_v9  ;;  %v1023_v12 = vpop.eup %1022 }
 0x6a0   :  { %1024 = vrcp.f32 %v482_v10 }
 0x6a1   :  { %1026 = vpow2.f32 %v920_v2 }
 0x6ad   :  { %v1025_v14 = vpop.eup %1024 }
 0x6ae   :  { %v490_v15 = vmul.f32 %v1025_v14, %v1023_v12  ;;  %v1027_v25 = vpop.eup %1026  ;;  %v489_v19 = vmul.f32 %v1025_v14, %v421_v50  ;;  %v648_v14 = vrot.slane %v1345_v28, 4 }
 0x6af   :  { %v483_v16 = vadd.f32 1.0, %v1027_v25 }
 0x6b0   :  { %492 = vrot.lane.b32.xlu0 %v490_v15, %s1152_s2 }
 0x6b1   :  { %1028 = vrcp.f32 %v483_v16 }
 0x6be   :  { %v1029_v35 = vpop.eup %1028 }
 0x722   :  { %v493_v20 = vpop.permute.xlu0 %492 }
 0x723   :  { %v495_v21 = vadd.f32 %v493_v20, %v489_v19 }
 0x725   :  { %1030 = vtanh.f32 %v495_v21 }
 0x732   :  { %v1031_v22 = vpop.eup %1030 }
 0x733   :  { %v497_v24 = vmul.f32 %v1031_v22, %v1029_v35 }
 0x735   :  { %v498_v26 = vpack.c.bf16 %v497_v24, %v497_v24 }
 0x737   :  { %500 = vrot.lane.b32.xlu1 %v498_v26, %s1152_s2 }
 0x7a9   :  { %v501_v27 = vpop.permute.xlu1 %500 }
 0x7aa   :  { %921 = vmatmul.mubr.msk.bf16.vlgmr.msra.gmra.mxu1 %vm207_vm1, %v501_v27 }
 0x7ab   :  { %664 = vmatpush1.bf16.msra.mxu1 %v1200_v3  ;;  %687 = vmatprep.mubr.bf16.mxu1 %v1151_v1 }
 0x7ac   :  { %665 = vmatprep.subr.bf16.mxu1 %v1206_v5 }
 0x7af   :  { %666 = vmatpush1.bf16.msra.mxu1 %v1212_v7 }
 0x7b0   :  { %667 = vmatprep.subr.bf16.mxu1 %v1224_v11 }
 0x7b3   :  { %668 = vmatpush1.bf16.msra.mxu1 %v1229_v13 }
 0x7b4   :  { %669 = vmatprep.subr.bf16.mxu1 %v1239_v17 }
 0x7b7   :  { %670 = vmatpush1.bf16.msra.mxu1 %v1244_v18 }
 0x7b8   :  { %944 = vmatprep.subr.mxu1 %v1150_v0 }
 0x86a   :  { %v539_v29 = vpop.f32.mrf.mxu1 }
 0x86b   :  { %v540_v30 = vadd.f32 %v539_v29, %v1345_v28 }
 0x86c   :  { %v541_v31 = vpop.f32.mrf.mxu1 }
 0x86d   :  { %v922_v32 = vmul.f32 -1.442695, %v540_v30  ;;  %v542_v38 = vadd.f32 %v541_v31, %v1350_v37 }
 0x86e   :  { %v543_v34 = vpop.f32.mrf.mxu1 }
 0x86f   :  { %1032 = vpow2.f32 %v922_v32  ;;  %v923_v42 = vmul.f32 -1.442695, %v542_v38 }
 0x870   :  { %v544_v36 = vpop.f32.mrf.mxu1  ;;  %1034 = vtanh.f32 %v542_v38 }
 0x87c   :  { %v1033_v39 = vpop.eup %1032 }
 0x87d   :  { %v552_v40 = vadd.f32 1.0, %v1033_v39  ;;  %v1035_v23 = vpop.eup %1034 }
 0x87f   :  { %1036 = vrcp.f32 %v552_v40 }
 0x880   :  { %1038 = vpow2.f32 %v923_v42  ;;  %v722_v42 = vrot.slane %v1345_v28, 6  ;;  %v799_v28 = vld [vmem:[%s1421_s4 + $0x38] sm:$0xff] }
 0x88c   :  { %v1037_v54 = vpop.eup %1036 }
 0x88d   :  { %v560_v41 = vmul.f32 %v1037_v54, %v1035_v23  ;;  %v1039_v43 = vpop.eup %1038  ;;  %v559_v45 = vmul.f32 %v1037_v54, %v495_v21  ;;  %v649_v21 = vrot.slane %v1350_v37, 4 }
 0x88e   :  { %v553_v44 = vadd.f32 1.0, %v1039_v43 }
 0x88f   :  { %562 = vrot.lane.b32.xlu0 %v560_v41, %s1152_s2 }
 0x890   :  { %1040 = vrcp.f32 %v553_v44 }
 0x89d   :  { %v1041_v33 = vpop.eup %1040 }
 0x901   :  { %v563_v46 = vpop.permute.xlu0 %562 }
 0x902   :  { %v565_v47 = vadd.f32 %v563_v46, %v559_v45 }
 0x904   :  { %1042 = vtanh.f32 %v565_v47 }
 0x911   :  { %v1043_v55 = vpop.eup %1042 }
 0x912   :  { %v567_v48 = vmul.f32 %v1043_v55, %v1041_v33  ;;  %v723_v55 = vrot.slane %v1350_v37, 6 }
 0x914   :  { %v568_v49 = vpack.c.bf16 %v567_v48, %v567_v48 }
 0x916   :  { %570 = vrot.lane.b32.xlu1 %v568_v49, %s1152_s2 }
 0x988   :  { %v571_v50 = vpop.permute.xlu1 %570 }
 0x989   :  { %924 = vmatmul.mubr.msk.bf16.vlgmr.msra.gmra.mxu0 %vm207_vm1, %v571_v50 }
 0x98a   :  { %738 = vmatpush1.bf16.msra.mxu0 %v1200_v3  ;;  %761 = vmatprep.mubr.bf16.mxu0 %v1151_v1 }
 0x98b   :  { %739 = vmatprep.subr.bf16.mxu0 %v1206_v5  ;;  %v575_v5 = vrot.slane %v1350_v37, 2  ;;  %v797_v37 = vld [vmem:[%s1421_s4 + $0x28] sm:$0xff] }
 0x98e   :  { %740 = vmatpush1.bf16.msra.mxu0 %v1212_v7 }
 0x98f   :  { %741 = vmatprep.subr.bf16.mxu0 %v1224_v11 }
 0x992   :  { %742 = vmatpush1.bf16.msra.mxu0 %v1229_v13 }
 0x993   :  { %743 = vmatprep.subr.bf16.mxu0 %v1239_v17 }
 0x996   :  { %744 = vmatpush1.bf16.msra.mxu0 %v1244_v18 }
 0xa49   :  { %v615_v52 = vpop.f32.mrf.mxu0 }
 0xa4a   :  { %v616_v53 = vadd.f32 %v615_v52, %v574_v51 }
 0xa4b   :  { %v617_v56 = vpop.f32.mrf.mxu0 }
 0xa4c   :  { %v925_v3 = vmul.f32 -1.442695, %v616_v53  ;;  %v618_v7 = vadd.f32 %v617_v56, %v575_v5  ;;  %v798_v56 = vld [vmem:[%s1421_s4 + $0x30] sm:$0xff]  ;;  %v793_v5 = vld [vmem:[%s1421_s4 + $0x8] sm:$0xff] }
 0xa4d   :  { %v619_v57 = vpop.f32.mrf.mxu0 }
 0xa4e   :  { %1044 = vpow2.f32 %v925_v3  ;;  %v926_v18 = vmul.f32 -1.442695, %v618_v7  ;;  %v796_v3 = vld [vmem:[%s1421_s4 + $0x20] sm:$0xff]  ;;  %v795_v57 = vld [vmem:[%s1421_s4 + $0x18] sm:$0xff] }
 0xa4f   :  { %v620_v1 = vpop.f32.mrf.mxu0  ;;  %1046 = vtanh.f32 %v618_v7  ;;  %v792_v7 = vld [vmem:[%s1421_s4] sm:$0xff] }
 0xa50   :  { %v794_v1 = vld [vmem:[%s1421_s4 + $0x10] sm:$0xff] }
 0xa5b   :  { %v1045_v58 = vpop.eup %1044 }
 0xa5c   :  { %v628_v11 = vadd.f32 1.0, %v1045_v58  ;;  %v1047_v13 = vpop.eup %1046 }
 0xa5e   :  { %1048 = vrcp.f32 %v628_v11 }
 0xa5f   :  { %1050 = vpow2.f32 %v926_v18 }
 0xa6b   :  { %v1049_v17 = vpop.eup %1048 }
 0xa6c   :  { %v636_v59 = vmul.f32 %v1049_v17, %v1047_v13  ;;  %v1051_v60 = vpop.eup %1050  ;;  %v635_v62 = vmul.f32 %v1049_v17, %v565_v47 }
 0xa6d   :  { %v629_v61 = vadd.f32 1.0, %v1051_v60 }
 0xa6e   :  { %638 = vrot.lane.b32.xlu0 %v636_v59, %s1152_s2 }
 0xa6f   :  { %1052 = vrcp.f32 %v629_v61 }
 0xa7c   :  { %v1053_v6 = vpop.eup %1052 }
 0xae0   :  { %v639_v63 = vpop.permute.xlu0 %638 }
 0xae1   :  { %v641_v4 = vadd.f32 %v639_v63, %v635_v62 }
 0xae3   :  { %1054 = vtanh.f32 %v641_v4 }
 0xaf0   :  { %v1055_v8 = vpop.eup %1054 }
 0xaf1   :  { %v643_v9 = vmul.f32 %v1055_v8, %v1053_v6 }
 0xaf3   :  { %v644_v10 = vpack.c.bf16 %v643_v9, %v643_v9 }
 0xaf5   :  { %646 = vrot.lane.b32.xlu1 %v644_v10, %s1152_s2 }
 0xb67   :  { %v647_v12 = vpop.permute.xlu1 %646 }
 0xb68   :  { %927 = vmatmul.mubr.msk.bf16.vlgmr.msra.gmra.mxu1 %vm207_vm1, %v647_v12 }
 0xb69   :  { %945 = vmatpush3.msra.mxu1 %v799_v28  ;;  %960 = vmatprep.mubr.msk.f32.mxu1 %vm1153_vm2, %v1150_v0 }
 0xb6a   :  { %946 = vmatprep.subr.mxu1 %v1150_v0 }
 0xb6b   :  { %947 = vmatpush3.msra.mxu1 %v798_v56 }
 0xb6c   :  { %948 = vmatprep.subr.mxu1 %v1150_v0 }
 0xb6d   :  { %949 = vmatpush3.msra.mxu1 %v797_v37 }
 0xb6e   :  { %950 = vmatprep.subr.mxu1 %v1150_v0 }
 0xb6f   :  { %951 = vmatpush3.msra.mxu1 %v796_v3 }
 0xb70   :  { %952 = vmatprep.subr.mxu1 %v1150_v0 }
 0xb71   :  { %953 = vmatpush3.msra.mxu1 %v795_v57 }
 0xb72   :  { %954 = vmatprep.subr.mxu1 %v1150_v0 }
 0xb73   :  { %955 = vmatpush3.msra.mxu1 %v794_v1 }
 0xb74   :  { %956 = vmatprep.subr.mxu1 %v1150_v0 }
 0xb75   :  { %957 = vmatpush3.msra.mxu1 %v793_v5 }
 0xb76   :  { %958 = vmatprep.subr.mxu1 %v1150_v0  ;;  %v933_v0 = vld [vmem:[%s1422_s5] ss:$0 sm:$0xff] }
 0xb77   :  { %959 = vmatpush3.msra.mxu1 %v792_v7 }
 0xc28   :  { %v689_v15 = vpop.f32.mrf.mxu1 }
 0xc29   :  { %v690_v2 = vadd.f32 %v689_v15, %v648_v14 }
 0xc2a   :  { %v691_v25 = vpop.f32.mrf.mxu1 }
 0xc2b   :  { %v928_v16 = vmul.f32 -1.442695, %v690_v2  ;;  %v692_v35 = vadd.f32 %v691_v25, %v649_v21 }
 0xc2c   :  { %v693_v19 = vpop.f32.mrf.mxu1 }
 0xc2d   :  { %1056 = vpow2.f32 %v928_v16  ;;  %v929_v30 = vmul.f32 -1.442695, %v692_v35 }
 0xc2e   :  { %v694_v20 = vpop.f32.mrf.mxu1  ;;  %1058 = vtanh.f32 %v692_v35 }
 0xc3a   :  { %v1057_v22 = vpop.eup %1056 }
 0xc3b   :  { %v702_v24 = vadd.f32 1.0, %v1057_v22  ;;  %v1059_v26 = vpop.eup %1058 }
 0xc3d   :  { %1060 = vrcp.f32 %v702_v24 }
 0xc3e   :  { %1062 = vpow2.f32 %v929_v30 }
 0xc4a   :  { %v1061_v27 = vpop.eup %1060 }
 0xc4b   :  { %v710_v29 = vmul.f32 %v1061_v27, %v1059_v26  ;;  %v1063_v31 = vpop.eup %1062  ;;  %v709_v34 = vmul.f32 %v1061_v27, %v641_v4 }
 0xc4c   :  { %v703_v32 = vadd.f32 1.0, %v1063_v31 }
 0xc4d   :  { %712 = vrot.lane.b32.xlu0 %v710_v29, %s1152_s2 }
 0xc4e   :  { %1064 = vrcp.f32 %v703_v32 }
 0xc5b   :  { %v1065_v39 = vpop.eup %1064 }
 0xcbf   :  { %v713_v36 = vpop.permute.xlu0 %712 }
 0xcc0   :  { %v715_v38 = vadd.f32 %v713_v36, %v709_v34 }
 0xcc2   :  { %1066 = vtanh.f32 %v715_v38 }
 0xccf   :  { %v1067_v40 = vpop.eup %1066 }
 0xcd0   :  { %v717_v23 = vmul.f32 %v1067_v40, %v1065_v39 }
 0xcd2   :  { %v718_v54 = vpack.c.bf16 %v717_v23, %v717_v23 }
 0xcd4   :  { %720 = vrot.lane.b32.xlu1 %v718_v54, %s1152_s2 }
 0xd46   :  { %v721_v41 = vpop.permute.xlu1 %720 }
 0xd47   :  { %930 = vmatmul.mubr.msk.bf16.vlgmr.msra.gmra.mxu0 %vm207_vm1, %v721_v41 }
 0xe07   :  { %v763_v43 = vpop.f32.mrf.mxu0 }
 0xe08   :  { %v764_v44 = vadd.f32 %v763_v43, %v722_v42 }
 0xe09   :  { %v765_v45 = vpop.f32.mrf.mxu0 }
 0xe0a   :  { %v931_v46 = vmul.f32 -1.442695, %v764_v44  ;;  %v766_v48 = vadd.f32 %v765_v45, %v723_v55 }
 0xe0b   :  { %v767_v47 = vpop.f32.mrf.mxu0 }
 0xe0c   :  { %1068 = vpow2.f32 %v931_v46  ;;  %v932_v58 = vmul.f32 -1.442695, %v766_v48 }
 0xe0d   :  { %v768_v33 = vpop.f32.mrf.mxu0  ;;  %1070 = vtanh.f32 %v766_v48 }
 0xe19   :  { %v1069_v49 = vpop.eup %1068 }
 0xe1a   :  { %v776_v50 = vadd.f32 1.0, %v1069_v49  ;;  %v1071_v51 = vpop.eup %1070 }
 0xe1c   :  { %1072 = vrcp.f32 %v776_v50 }
 0xe1d   :  { %1074 = vpow2.f32 %v932_v58 }
 0xe29   :  { %v1073_v52 = vpop.eup %1072 }
 0xe2a   :  { %v784_v53 = vmul.f32 %v1073_v52, %v1071_v51  ;;  %v1075_v11 = vpop.eup %1074  ;;  %v783_v17 = vmul.f32 %v1073_v52, %v715_v38 }
 0xe2b   :  { %v777_v13 = vadd.f32 1.0, %v1075_v11 }
 0xe2c   :  { %786 = vrot.lane.b32.xlu0 %v784_v53, %s1152_s2 }
 0xe2d   :  { %1076 = vrcp.f32 %v777_v13 }
 0xe3a   :  { %v1077_v60 = vpop.eup %1076 }
 0xe9e   :  { %v787_v59 = vpop.permute.xlu0 %786 }
 0xe9f   :  { %v789_v18 = vadd.f32 %v787_v59, %v783_v17 }
 0xea1   :  { %1078 = vtanh.f32 %v789_v18 }
 0xeae   :  { %v1079_v61 = vpop.eup %1078 }
 0xeaf   :  { %v791_v62 = vmul.f32 %v1079_v61, %v1077_v60 }
 0xeb1   :  { %808 = vrot.lane.b32.xlu1 %v791_v62, %s1152_s2 }
 0xf23   :  { %v809_v63 = vpop.permute.xlu1 %808 }
 0xf24   :  { %961 = vmatmul.mubr.msk.f32.vlgmr.msra.gmra.mxu1 %vm207_vm1, %v809_v63 }
 0xfe4   :  { %v878_v4 = vpop.f32.mrf.mxu1 }
 0xfe5   :  { %v879_v6 = vadd.f32 %v933_v0, %v878_v4 }
 0xfe6   :  { %v962_v8 = vpop.f32.mrf.mxu1 }
 0xfe7   :  { %883 = vst.msk [vmem:[#allocation7] sm:$0x3] %vm882_vm3, %v879_v6 }
 0xfe8   :  { %1131 = shalt.err (!%p1128_p0)
}
 0xfe9   :  { %893 = dma.vmem_to_hbm [thread:$0]  %s891_s16, 32, %s1423_s6, [#allocation4]  }
 0xfea   :  { %1144 = dma.done.wait [#allocation4], 32  }
 0xfeb   :  { %1145 = vsyncadd [#allocation4], 4294967264 }
 0xfec   :  { %897 = vsyncpa [#allocation3], 1 }
 0xfed   :  { %898 = vsyncpa [#allocation6], 1 }
 0xfee   :  { %899 = vsyncpa [#allocation4], 1 }

</bundles_post_ra>
